<compile_context>
chip_gen: v6e
topology: v6e:2x2x1
jax: 0.10.0
libtpu: 0.0.40
codegen_flags: <defaults>
</compile_context>

<pallas_src>
import math
from functools import partial

import jax
import jax.numpy as jnp
from jax.experimental import pallas as pl
from jax.experimental.pallas import tpu as pltpu

TM = 256                     # row tile for the tiled (large-M) path
LANE = 128                   # channel dims padded to a multiple of this (lane-dense I/O)
BN_EPS = 1e-5                # PyTorch BatchNorm2d default eps
SMALL_M_MAX = 1024           # single fully-fused VMEM kernel below this many rows
VMEM_LIMIT = 32 * 1024 * 1024


def _round_up(x, k):
    return ((x + k - 1) // k) * k


# ---------------------------------------------------------------------------
# Small-problem path: one grid-less kernel, all layers fused in VMEM.
# ---------------------------------------------------------------------------
def _fc_small_kernel(*refs, n_layers, relus, m_valid):
    x_ref = refs[0]
    out_ref = refs[-1]
    p_refs = refs[1:-1]                      # 4 refs per layer: w, b, gamma, beta

    h = x_ref[...]
    m_pad = h.shape[0]
    row = jax.lax.broadcasted_iota(jnp.int32, (m_pad, 1), 0)
    mask = (row < m_valid).astype(jnp.float32)
    inv_m = 1.0 / m_valid

    for l in range(n_layers):
        w = p_refs[4 * l][...]
        b = p_refs[4 * l + 1][...]
        gamma = p_refs[4 * l + 2][...]
        beta = p_refs[4 * l + 3][...]

        y = jnp.dot(h, w, preferred_element_type=jnp.float32) + b
        ym = y * mask
        mean = jnp.sum(ym, axis=0, keepdims=True) * inv_m
        d = (y - mean) * mask
        var = jnp.sum(d * d, axis=0, keepdims=True) * inv_m
        scale = gamma * jax.lax.rsqrt(var + BN_EPS)
        shift = beta - mean * scale
        h = y * scale + shift
        if relus[l]:
            h = jnp.maximum(h, 0.0)

    out_ref[...] = h


def _fc_small(x2d, padded_params, relus, m):
    m_pad = _round_up(max(m, 8), 8)
    c0 = padded_params[0][0].shape[0]
    c_last = padded_params[-1][0].shape[1]
    x = jnp.pad(x2d, ((0, m_pad - m), (0, c0 - x2d.shape[1])))

    args = [x]
    for (w, b, g, be) in padded_params:
        args += [w, b, g, be]

    return pl.pallas_call(
        partial(_fc_small_kernel, n_layers=len(padded_params),
                relus=tuple(relus), m_valid=m),
        out_shape=jax.ShapeDtypeStruct((m_pad, c_last), jnp.float32),
        compiler_params=pltpu.CompilerParams(vmem_limit_bytes=VMEM_LIMIT),
    )(*args)


# ---------------------------------------------------------------------------
# Large-problem path: tiled conv (+ fused previous-layer BN/ReLU) + per-tile stats.
# ---------------------------------------------------------------------------
def _conv_stats_kernel(*refs, tm, m_valid, fuse_in, in_relu):
    if fuse_in:
        x_ref, sc_ref, sh_ref, w_ref, b_ref, y_ref, sum_ref, m2_ref = refs
    else:
        x_ref, w_ref, b_ref, y_ref, sum_ref, m2_ref = refs
        sc_ref = sh_ref = None

    i = pl.program_id(0)

    x = x_ref[...]
    if fuse_in:
        x = x * sc_ref[...] + sh_ref[...]
        if in_relu:
            x = jnp.maximum(x, 0.0)

    y = jnp.dot(x, w_ref[...], preferred_element_type=jnp.float32) + b_ref[...]
    y_ref[...] = y

    rem = m_valid % tm           # static Python int

    def _unmasked_stats():
        ssum = jnp.sum(y, axis=0, keepdims=True)
        mean_t = ssum * (1.0 / tm)
        d = y - mean_t
        sum_ref[...] = ssum[None]
        m2_ref[...] = jnp.sum(d * d, axis=0, keepdims=True)[None]

    if rem == 0:
        _unmasked_stats()
    else:
        is_last = i == pl.num_programs(0) - 1

        @pl.when(jnp.logical_not(is_last))
        def _():
            _unmasked_stats()

        @pl.when(is_last)
        def _():
            row = jax.lax.broadcasted_iota(jnp.int32, (tm, 1), 0)
            mask = (row < rem).astype(jnp.float32)
            ym = y * mask
            ssum = jnp.sum(ym, axis=0, keepdims=True)
            mean_t = ssum * (1.0 / rem)
            d = (y - mean_t) * mask
            sum_ref[...] = ssum[None]
            m2_ref[...] = jnp.sum(d * d, axis=0, keepdims=True)[None]


def _conv_layer(h, in_scale, in_shift, in_relu, w, b, gamma, beta, m):
    """One 1x1-conv layer on (m_pad, c_in_pad) rows; previous layer's BN/ReLU fused in.

    Returns (raw y, scale, shift) where scale/shift are this layer's BN affine
    computed from batch statistics (biased variance)."""
    m_pad, c_in = h.shape
    c_out = w.shape[1]
    nt = m_pad // TM
    fuse_in = in_scale is not None

    in_specs = [pl.BlockSpec((TM, c_in), lambda i: (i, 0))]
    args = [h]
    if fuse_in:
        in_specs += [pl.BlockSpec((1, c_in), lambda i: (0, 0)),
                     pl.BlockSpec((1, c_in), lambda i: (0, 0))]
        args += [in_scale, in_shift]
    in_specs += [pl.BlockSpec((c_in, c_out), lambda i: (0, 0)),
                 pl.BlockSpec((1, c_out), lambda i: (0, 0))]
    args += [w, b]

    y, sum_t, m2_t = pl.pallas_call(
        partial(_conv_stats_kernel, tm=TM, m_valid=m,
                fuse_in=fuse_in, in_relu=in_relu),
        out_shape=(
            jax.ShapeDtypeStruct((m_pad, c_out), jnp.float32),
            jax.ShapeDtypeStruct((nt, 1, c_out), jnp.float32),
            jax.ShapeDtypeStruct((nt, 1, c_out), jnp.float32),
        ),
        grid_spec=pltpu.PrefetchScalarGridSpec(
            num_scalar_prefetch=0,
            grid=(nt,),
            in_specs=in_specs,
            out_specs=(
                pl.BlockSpec((TM, c_out), lambda i: (i, 0)),
                pl.BlockSpec((1, 1, c_out), lambda i: (i, 0, 0)),
                pl.BlockSpec((1, 1, c_out), lambda i: (i, 0, 0)),
            ),
        ),
        compiler_params=pltpu.CompilerParams(
            dimension_semantics=("parallel",),
            vmem_limit_bytes=VMEM_LIMIT,
        ),
    )(*args)

    # Merge per-tile statistics (cancellation-safe: per-tile centered 2nd moments).
    rem = m % TM
    counts = jnp.full((nt, 1), float(TM), jnp.float32)
    if rem:
        counts = counts.at[-1, 0].set(float(rem))
    sum_t = sum_t[:, 0, :]                                   # (nt, c_out)
    m2_t = m2_t[:, 0, :]
    mean = jnp.sum(sum_t, axis=0, keepdims=True) / m          # (1, c_out)
    mean_t = sum_t / counts
    var = (jnp.sum(m2_t, axis=0, keepdims=True)
           + jnp.sum(counts * (mean_t - mean) ** 2, axis=0, keepdims=True)) / m
    var = jnp.maximum(var, 0.0)
    inv_std = jax.lax.rsqrt(var + BN_EPS)
    scale = gamma * inv_std
    shift = beta - mean * scale
    return y, scale, shift


def _bn_act_kernel(y_ref, scale_ref, shift_ref, o_ref, *, apply_relu):
    out = y_ref[...] * scale_ref[...] + shift_ref[...]
    if apply_relu:
        out = jnp.maximum(out, 0.0)
    o_ref[...] = out


def _bn_act(y, scale, shift, apply_relu):
    m_pad, c = y.shape
    nt = m_pad // TM
    return pl.pallas_call(
        partial(_bn_act_kernel, apply_relu=apply_relu),
        out_shape=jax.ShapeDtypeStruct((m_pad, c), jnp.float32),
        grid_spec=pltpu.PrefetchScalarGridSpec(
            num_scalar_prefetch=0,
            grid=(nt,),
            in_specs=[
                pl.BlockSpec((TM, c), lambda i: (i, 0)),
                pl.BlockSpec((1, c), lambda i: (0, 0)),
                pl.BlockSpec((1, c), lambda i: (0, 0)),
            ],
            out_specs=pl.BlockSpec((TM, c), lambda i: (i, 0)),
        ),
        input_output_aliases={0: 0},
        compiler_params=pltpu.CompilerParams(
            dimension_semantics=("parallel",),
            vmem_limit_bytes=VMEM_LIMIT,
        ),
    )(y, scale, shift)


def _fc_large(x2d, padded_params, relus, m):
    m_pad = _round_up(m, TM)
    c0 = padded_params[0][0].shape[0]
    h = jnp.pad(x2d, ((0, m_pad - m), (0, c0 - x2d.shape[1])))   # pad M & C once

    scale = shift = None
    prev_relu = False
    for (w, b, g, be), r in zip(padded_params, relus):
        h, scale, shift = _conv_layer(h, scale, shift, prev_relu, w, b, g, be, m)
        prev_relu = r
    return _bn_act(h, scale, shift, prev_relu)


# ---------------------------------------------------------------------------
# Parameter handling / forward
# ---------------------------------------------------------------------------
def _pad_params(params):
    """Zero-pad channel dims to multiples of LANE. gamma is padded with 0 so padded
    channels stay exactly 0 through every layer."""
    padded = []
    for (w, b, gamma, beta) in params:
        c_in, c_out = w.shape
        cip, cop = _round_up(c_in, LANE), _round_up(c_out, LANE)
        wp = jnp.zeros((cip, cop), jnp.float32).at[:c_in, :c_out].set(w)
        bp = jnp.zeros((1, cop), jnp.float32).at[0, :c_out].set(b)
        gp = jnp.zeros((1, cop), jnp.float32).at[0, :c_out].set(gamma)
        bep = jnp.zeros((1, cop), jnp.float32).at[0, :c_out].set(beta)
        padded.append((wp, bp, gp, bep))
    return padded


def init_fc_params(key, input_dims, units):
    """Deterministic init mirroring the PyTorch module's __init__."""
    params = []
    for c_in, c_out in zip(input_dims, units):
        key, sub = jax.random.split(key)
        # xavier_uniform_ on a (C_out, C_in, 1, 1) conv weight: fan_in=C_in, fan_out=C_out
        bound = math.sqrt(6.0 / (c_in + c_out))
        w = jax.random.uniform(sub, (c_in, c_out), jnp.float32, -bound, bound)
        b = jnp.zeros((c_out,), jnp.float32)          # zeros_ init
        gamma = jnp.ones((c_out,), jnp.float32)       # BN default affine
        beta = jnp.zeros((c_out,), jnp.float32)
        params.append((w, b, gamma, beta))
    return params


@partial(jax.jit, static_argnums=(2,))
def fc_forward(x, params, activations):
    """Mirrors FC.forward. x: (B, T, N, C_in) channels-last, f32."""
    b, t, n, c = x.shape
    m = b * t * n
    x2d = x.reshape(m, c).astype(jnp.float32)
    relus = tuple(a is not None for a in activations)   # conv2d_ applies ReLU if act set
    padded = _pad_params(params)
    c_out_final = params[-1][0].shape[1]

    # VMEM budget estimate for the fully-fused single-call path.
    cp = [padded[0][0].shape[0]] + [p[0].shape[1] for p in padded]
    m_pad_small = _round_up(max(m, 8), 8)
    est_bytes = 4 * (m_pad_small * sum(cp)
                     + sum(int(w.size) for (w, _, _, _) in padded))
    if m <= SMALL_M_MAX and est_bytes <= 12 * 1024 * 1024:
        out2d = _fc_small(x2d, padded, relus, m)
    else:
        out2d = _fc_large(x2d, padded, relus, m)

    return out2d[:m, :c_out_final].reshape(b, t, n, c_out_final)


# ---------------------------------------------------------------------------
# Pure-JAX reference (PyTorch semantics) for validation
# ---------------------------------------------------------------------------
def fc_reference(x, params, activations):
    b, t, n, _ = x.shape
    h = x.reshape(-1, x.shape[-1]).astype(jnp.float32)
    for (w, bias, gamma, beta), act in zip(params, activations):
        y = h @ w + bias
        mean = jnp.mean(y, axis=0)
        var = jnp.mean((y - mean) ** 2, axis=0)          # biased variance (train mode)
        h = (y - mean) * (gamma / jnp.sqrt(var + BN_EPS)) + beta
        if act is not None:
            h = jnp.maximum(h, 0.0)
    return h.reshape(b, t, n, -1)


if __name__ == "__main__":
    key = jax.random.PRNGKey(0)
    B, T, N, C = 2, 8, 4, 4                  # batch, time steps, nodes, features
    input_dims = [C, 32]
    units = [32, 16]
    activations = ("relu", None)             # FC(...) with two conv2d_ layers

    kx, kp, kx2 = jax.random.split(key, 3)
    x = jax.random.normal(kx, (B, T, N, C), jnp.float32)
    params = init_fc_params(kp, input_dims, units)

    # Small-M path (single fused VMEM kernel)
    out = jax.block_until_ready(fc_forward(x, params, activations))
    assert out.shape == (B, T, N, units[-1]), out.shape
    assert jnp.isfinite(out).all()
    ref = fc_reference(x, params, activations)
    assert jnp.allclose(out, ref, atol=2e-3, rtol=2e-3), \
        float(jnp.max(jnp.abs(out - ref)))

    # Tiled path (M = 4*12*30 = 1440 > SMALL_M_MAX, M % TM != 0 exercises masking)
    B2, T2, N2 = 4, 12, 30
    x2 = jax.random.normal(kx2, (B2, T2, N2, C), jnp.float32)
    out2 = jax.block_until_ready(fc_forward(x2, params, activations))
    assert out2.shape == (B2, T2, N2, units[-1]), out2.shape
    assert jnp.isfinite(out2).all()
    ref2 = fc_reference(x2, params, activations)
    assert jnp.allclose(out2, ref2, atol=2e-3, rtol=2e-3), \
        float(jnp.max(jnp.abs(out2 - ref2)))

    print("KERNEL_OK")
</pallas_src>

<mosaic_0001>
module attributes {stable_mosaic.version = 11 : i64} {
  func.func @_fc_small_kernel(%arg0: memref<64x128xf32, #tpu.memory_space<vmem>>, %arg1: memref<128x128xf32, #tpu.memory_space<vmem>>, %arg2: memref<1x128xf32, #tpu.memory_space<vmem>>, %arg3: memref<1x128xf32, #tpu.memory_space<vmem>>, %arg4: memref<1x128xf32, #tpu.memory_space<vmem>>, %arg5: memref<128x128xf32, #tpu.memory_space<vmem>>, %arg6: memref<1x128xf32, #tpu.memory_space<vmem>>, %arg7: memref<1x128xf32, #tpu.memory_space<vmem>>, %arg8: memref<1x128xf32, #tpu.memory_space<vmem>>, %arg9: memref<64x128xf32, #tpu.memory_space<vmem>>) attributes {dimension_semantics = [], scalar_prefetch = 0 : i64, scratch_operands = 0 : i64, tpu.core_type = #tpu.core_type<tc>} {
    %c0 = arith.constant 0 : index
    %c0_0 = arith.constant 0 : index
    %0 = vector.load %arg0[%c0, %c0_0] : memref<64x128xf32, #tpu.memory_space<vmem>>, vector<64x128xf32>
    %1 = tpu.iota {dimensions = array<i32: 0>} : vector<64x1xi32>
    %c64_i32 = arith.constant 64 : i32
    %2 = vector.broadcast %c64_i32 : i32 to vector<64x1xi32>
    %3 = arith.cmpi slt, %1, %2 : vector<64x1xi32>
    %4 = arith.extui %3 : vector<64x1xi1> to vector<64x1xi32>
    %5 = arith.sitofp %4 : vector<64x1xi32> to vector<64x1xf32>
    %c0_1 = arith.constant 0 : index
    %c0_2 = arith.constant 0 : index
    %6 = vector.load %arg1[%c0_1, %c0_2] : memref<128x128xf32, #tpu.memory_space<vmem>>, vector<128x128xf32>
    %c0_3 = arith.constant 0 : index
    %c0_4 = arith.constant 0 : index
    %7 = vector.load %arg2[%c0_3, %c0_4] : memref<1x128xf32, #tpu.memory_space<vmem>>, vector<1x128xf32>
    %c0_5 = arith.constant 0 : index
    %c0_6 = arith.constant 0 : index
    %8 = vector.load %arg3[%c0_5, %c0_6] : memref<1x128xf32, #tpu.memory_space<vmem>>, vector<1x128xf32>
    %c0_7 = arith.constant 0 : index
    %c0_8 = arith.constant 0 : index
    %9 = vector.load %arg4[%c0_7, %c0_8] : memref<1x128xf32, #tpu.memory_space<vmem>>, vector<1x128xf32>
    %cst = arith.constant dense<0.000000e+00> : vector<64x128xf32>
    %10 = tpu.matmul %0, %6, %cst {dimension_numbers = #tpu.dot_dimension_numbers<[1], [0], [0], [1], [0, 0, 1, 1], [], []>} : vector<64x128xf32>, vector<128x128xf32>, vector<64x128xf32> -> vector<64x128xf32>
    %11 = vector.broadcast %7 : vector<1x128xf32> to vector<64x128xf32>
    %12 = arith.addf %10, %11 : vector<64x128xf32>
    %13 = vector.broadcast %5 : vector<64x1xf32> to vector<64x128xf32>
    %14 = arith.mulf %12, %13 : vector<64x128xf32>
    %cst_9 = arith.constant dense<0.000000e+00> : vector<128xf32>
    %15 = vector.multi_reduction <add>, %14, %cst_9 [0] : vector<64x128xf32> to vector<128xf32>
    %16 = vector.shape_cast %15 : vector<128xf32> to vector<1x128xf32>
    %cst_10 = arith.constant 1.562500e-02 : f32
    %17 = vector.broadcast %cst_10 : f32 to vector<1x128xf32>
    %18 = arith.mulf %16, %17 : vector<1x128xf32>
    %19 = vector.broadcast %18 : vector<1x128xf32> to vector<64x128xf32>
    %20 = arith.subf %12, %19 : vector<64x128xf32>
    %21 = vector.broadcast %5 : vector<64x1xf32> to vector<64x128xf32>
    %22 = arith.mulf %20, %21 : vector<64x128xf32>
    %23 = arith.mulf %22, %22 : vector<64x128xf32>
    %cst_11 = arith.constant dense<0.000000e+00> : vector<128xf32>
    %24 = vector.multi_reduction <add>, %23, %cst_11 [0] : vector<64x128xf32> to vector<128xf32>
    %25 = vector.shape_cast %24 : vector<128xf32> to vector<1x128xf32>
    %cst_12 = arith.constant 1.562500e-02 : f32
    %26 = vector.broadcast %cst_12 : f32 to vector<1x128xf32>
    %27 = arith.mulf %25, %26 : vector<1x128xf32>
    %cst_13 = arith.constant 9.99999974E-6 : f32
    %28 = vector.broadcast %cst_13 : f32 to vector<1x128xf32>
    %29 = arith.addf %27, %28 : vector<1x128xf32>
    %30 = math.rsqrt %29 : vector<1x128xf32>
    %31 = arith.mulf %8, %30 : vector<1x128xf32>
    %32 = arith.mulf %18, %31 : vector<1x128xf32>
    %33 = arith.subf %9, %32 : vector<1x128xf32>
    %34 = vector.broadcast %31 : vector<1x128xf32> to vector<64x128xf32>
    %35 = arith.mulf %12, %34 : vector<64x128xf32>
    %36 = vector.broadcast %33 : vector<1x128xf32> to vector<64x128xf32>
    %37 = arith.addf %35, %36 : vector<64x128xf32>
    %cst_14 = arith.constant 0.000000e+00 : f32
    %38 = vector.broadcast %cst_14 : f32 to vector<64x128xf32>
    %39 = arith.maximumf %37, %38 : vector<64x128xf32>
    %c0_15 = arith.constant 0 : index
    %c0_16 = arith.constant 0 : index
    %40 = vector.load %arg5[%c0_15, %c0_16] : memref<128x128xf32, #tpu.memory_space<vmem>>, vector<128x128xf32>
    %c0_17 = arith.constant 0 : index
    %c0_18 = arith.constant 0 : index
    %41 = vector.load %arg6[%c0_17, %c0_18] : memref<1x128xf32, #tpu.memory_space<vmem>>, vector<1x128xf32>
    %c0_19 = arith.constant 0 : index
    %c0_20 = arith.constant 0 : index
    %42 = vector.load %arg7[%c0_19, %c0_20] : memref<1x128xf32, #tpu.memory_space<vmem>>, vector<1x128xf32>
    %c0_21 = arith.constant 0 : index
    %c0_22 = arith.constant 0 : index
    %43 = vector.load %arg8[%c0_21, %c0_22] : memref<1x128xf32, #tpu.memory_space<vmem>>, vector<1x128xf32>
    %cst_23 = arith.constant dense<0.000000e+00> : vector<64x128xf32>
    %44 = tpu.matmul %39, %40, %cst_23 {dimension_numbers = #tpu.dot_dimension_numbers<[1], [0], [0], [1], [0, 0, 1, 1], [], []>} : vector<64x128xf32>, vector<128x128xf32>, vector<64x128xf32> -> vector<64x128xf32>
    %45 = vector.broadcast %41 : vector<1x128xf32> to vector<64x128xf32>
    %46 = arith.addf %44, %45 : vector<64x128xf32>
    %47 = vector.broadcast %5 : vector<64x1xf32> to vector<64x128xf32>
    %48 = arith.mulf %46, %47 : vector<64x128xf32>
    %cst_24 = arith.constant dense<0.000000e+00> : vector<128xf32>
    %49 = vector.multi_reduction <add>, %48, %cst_24 [0] : vector<64x128xf32> to vector<128xf32>
    %50 = vector.shape_cast %49 : vector<128xf32> to vector<1x128xf32>
    %cst_25 = arith.constant 1.562500e-02 : f32
    %51 = vector.broadcast %cst_25 : f32 to vector<1x128xf32>
    %52 = arith.mulf %50, %51 : vector<1x128xf32>
    %53 = vector.broadcast %52 : vector<1x128xf32> to vector<64x128xf32>
    %54 = arith.subf %46, %53 : vector<64x128xf32>
    %55 = vector.broadcast %5 : vector<64x1xf32> to vector<64x128xf32>
    %56 = arith.mulf %54, %55 : vector<64x128xf32>
    %57 = arith.mulf %56, %56 : vector<64x128xf32>
    %cst_26 = arith.constant dense<0.000000e+00> : vector<128xf32>
    %58 = vector.multi_reduction <add>, %57, %cst_26 [0] : vector<64x128xf32> to vector<128xf32>
    %59 = vector.shape_cast %58 : vector<128xf32> to vector<1x128xf32>
    %cst_27 = arith.constant 1.562500e-02 : f32
    %60 = vector.broadcast %cst_27 : f32 to vector<1x128xf32>
    %61 = arith.mulf %59, %60 : vector<1x128xf32>
    %cst_28 = arith.constant 9.99999974E-6 : f32
    %62 = vector.broadcast %cst_28 : f32 to vector<1x128xf32>
    %63 = arith.addf %61, %62 : vector<1x128xf32>
    %64 = math.rsqrt %63 : vector<1x128xf32>
    %65 = arith.mulf %42, %64 : vector<1x128xf32>
    %66 = arith.mulf %52, %65 : vector<1x128xf32>
    %67 = arith.subf %43, %66 : vector<1x128xf32>
    %68 = vector.broadcast %65 : vector<1x128xf32> to vector<64x128xf32>
    %69 = arith.mulf %46, %68 : vector<64x128xf32>
    %70 = vector.broadcast %67 : vector<1x128xf32> to vector<64x128xf32>
    %71 = arith.addf %69, %70 : vector<64x128xf32>
    %c0_29 = arith.constant 0 : index
    %c0_30 = arith.constant 0 : index
    %72 = vector.load %arg9[%c0_29, %c0_30] : memref<64x128xf32, #tpu.memory_space<vmem>>, vector<64x128xf32>
    tpu.vector_store %arg9[%c0_29, %c0_30], %71 {strides = array<i32>} : memref<64x128xf32, #tpu.memory_space<vmem>>, vector<64x128xf32>,
    return
  }
}

</mosaic_0001>

<bundles_post_ra>
// kernel: fc_forward.1
= control target key start
LH: loop header
LB: loop body
LE: loop exit
PB: predicated region body
PF: predicated region fallthrough
CT: control target
= control target key end

     0   :  { %s989_s0 = inlined_call_operand.vmem [shape: f32[64,128], index: 0, kind: input, shape index: {}]   ;;  %s990_s1 = inlined_call_operand.vmem [shape: f32[128,128], index: 1, kind: input, shape index: {}]   ;;  %s991_s2 = inlined_call_operand.vmem [shape: f32[1,128], index: 2, kind: input, shape index: {}]   ;;  %s992_s3 = inlined_call_operand.vmem [shape: f32[1,128], index: 3, kind: input, shape index: {}]   ;;  %s993_s4 = inlined_call_operand.vmem [shape: f32[1,128], index: 4, kind: input, shape index: {}]   ;;  %s994_s5 = inlined_call_operand.vmem [shape: f32[128,128], index: 5, kind: input, shape index: {}]   ;;  %s995_s6 = inlined_call_operand.vmem [shape: f32[1,128], index: 6, kind: input, shape index: {}]   ;;  %s996_s7 = inlined_call_operand.vmem [shape: f32[1,128], index: 7, kind: input, shape index: {}]   ;;  %s997_s8 = inlined_call_operand.vmem [shape: f32[1,128], index: 8, kind: input, shape index: {}]   ;;  %s998_s9 = inlined_call_operand.hbm [shape: f32[64,128], index: 9, kind: output, shape index: {}]  }
   0x1   :  { %v89_v0 = vld [vmem:[%s990_s1 + $0x78] sm:$0xff]  ;;  %v88_v1 = vld [vmem:[%s990_s1 + $0x70] sm:$0xff]  ;;  %v87_v2 = vld [vmem:[%s990_s1 + $0x68] sm:$0xff] }
   0x2   :  { %602 = vmatprep.subr.mxu0 %v89_v0  ;;  %v86_v3 = vld [vmem:[%s990_s1 + $0x60] sm:$0xff]  ;;  %v85_v5 = vld [vmem:[%s990_s1 + $0x58] sm:$0xff]  ;;  %v84_v6 = vld [vmem:[%s990_s1 + $0x50] sm:$0xff] }
   0x3   :  { %603 = vmatpush3.msra.mxu0 %v89_v0  ;;  %v33_v4 = vld [vmem:[%s989_s0] sm:$0xff] }
   0x4   :  { %604 = vmatprep.subr.mxu0 %v88_v1  ;;  %634 = vmatprep.mubr.f32.mxu0 %v33_v4 }
   0x5   :  { %605 = vmatpush3.msra.mxu0 %v88_v1 }
   0x6   :  { %606 = vmatprep.subr.mxu0 %v87_v2 }
   0x7   :  { %607 = vmatpush3.msra.mxu0 %v87_v2 }
   0x8   :  { %608 = vmatprep.subr.mxu0 %v86_v3 }
   0x9   :  { %609 = vmatpush3.msra.mxu0 %v86_v3 }
   0xa   :  { %14 = vsyncpa [#allocation3], 0  ;;  %610 = vmatprep.subr.mxu0 %v85_v5  ;;  %v83_v7 = vld [vmem:[%s990_s1 + $0x48] sm:$0xff]  ;;  %v82_v8 = vld [vmem:[%s990_s1 + $0x40] sm:$0xff] }
   0xb   :  { %611 = vmatpush3.msra.mxu0 %v85_v5  ;;  %v81_v9 = vld [vmem:[%s990_s1 + $0x38] sm:$0xff]  ;;  %v80_v10 = vld [vmem:[%s990_s1 + $0x30] sm:$0xff]  ;;  %v79_v11 = vld [vmem:[%s990_s1 + $0x28] sm:$0xff] }
   0xc   :  { %612 = vmatprep.subr.mxu0 %v84_v6  ;;  %v78_v12 = vld [vmem:[%s990_s1 + $0x20] sm:$0xff]  ;;  %v77_v13 = vld [vmem:[%s990_s1 + $0x18] sm:$0xff]  ;;  %v76_v14 = vld [vmem:[%s990_s1 + $0x10] sm:$0xff] }
   0xd   :  { %613 = vmatpush3.msra.mxu0 %v84_v6  ;;  %v75_v15 = vld [vmem:[%s990_s1 + $0x8] sm:$0xff]  ;;  %v74_v16 = vld [vmem:[%s990_s1] sm:$0xff]  ;;  %v35_v18 = vld [vmem:[%s989_s0 + $0x10] sm:$0xff] }
   0xe   :  { %614 = vmatprep.subr.mxu0 %v83_v7  ;;  %v34_v17 = vld [vmem:[%s989_s0 + $0x8] sm:$0xff]  ;;  %v36_v19 = vld [vmem:[%s989_s0 + $0x18] sm:$0xff]  ;;  %v37_v20 = vld [vmem:[%s989_s0 + $0x20] sm:$0xff] }
   0xf   :  { %615 = vmatpush3.msra.mxu0 %v83_v7  ;;  %v38_v21 = vld [vmem:[%s989_s0 + $0x28] sm:$0xff]  ;;  %v39_v22 = vld [vmem:[%s989_s0 + $0x30] sm:$0xff]  ;;  %v40_v23 = vld [vmem:[%s989_s0 + $0x38] sm:$0xff] }
  0x10   :  { %616 = vmatprep.subr.mxu0 %v82_v8  ;;  %v320_v24 = vld [vmem:[%s994_s5 + $0x78] sm:$0xff]  ;;  %v319_v25 = vld [vmem:[%s994_s5 + $0x70] sm:$0xff]  ;;  %v318_v26 = vld [vmem:[%s994_s5 + $0x68] sm:$0xff] }
  0x11   :  { %617 = vmatpush3.msra.mxu0 %v82_v8  ;;  %646 = vmatprep.subr.mxu1 %v320_v24  ;;  %v317_v27 = vld [vmem:[%s994_s5 + $0x60] sm:$0xff]  ;;  %v316_v28 = vld [vmem:[%s994_s5 + $0x58] sm:$0xff]  ;;  %v315_v29 = vld [vmem:[%s994_s5 + $0x50] sm:$0xff] }
  0x12   :  { %618 = vmatprep.subr.mxu0 %v81_v9  ;;  %647 = vmatpush3.msra.mxu1 %v320_v24  ;;  %v314_v30 = vld [vmem:[%s994_s5 + $0x48] sm:$0xff]  ;;  %v313_v31 = vld [vmem:[%s994_s5 + $0x40] sm:$0xff]  ;;  %v312_v32 = vld [vmem:[%s994_s5 + $0x38] sm:$0xff] }
  0x13   :  { %619 = vmatpush3.msra.mxu0 %v81_v9  ;;  %648 = vmatprep.subr.mxu1 %v319_v25  ;;  %v311_v33 = vld [vmem:[%s994_s5 + $0x30] sm:$0xff]  ;;  %v310_v34 = vld [vmem:[%s994_s5 + $0x28] sm:$0xff]  ;;  %v309_v35 = vld [vmem:[%s994_s5 + $0x20] sm:$0xff] }
  0x14   :  { %620 = vmatprep.subr.mxu0 %v80_v10  ;;  %649 = vmatpush3.msra.mxu1 %v319_v25  ;;  %v308_v36 = vld [vmem:[%s994_s5 + $0x18] sm:$0xff]  ;;  %v307_v37 = vld [vmem:[%s994_s5 + $0x10] sm:$0xff]  ;;  %v306_v38 = vld [vmem:[%s994_s5 + $0x8] sm:$0xff] }
  0x15   :  { %621 = vmatpush3.msra.mxu0 %v80_v10  ;;  %650 = vmatprep.subr.mxu1 %v318_v26  ;;  %v305_v39 = vld [vmem:[%s994_s5] sm:$0xff] }
  0x16   :  { %622 = vmatprep.subr.mxu0 %v79_v11  ;;  %651 = vmatpush3.msra.mxu1 %v318_v26  ;;  %v552_v41 = vld [vmem:[%s991_s2] ss:$0 sm:$0xff] }
  0x17   :  { %623 = vmatpush3.msra.mxu0 %v79_v11  ;;  %652 = vmatprep.subr.mxu1 %v317_v27 }
  0x18   :  { %624 = vmatprep.subr.mxu0 %v78_v12  ;;  %653 = vmatpush3.msra.mxu1 %v317_v27 }
  0x19   :  { %625 = vmatpush3.msra.mxu0 %v78_v12  ;;  %654 = vmatprep.subr.mxu1 %v316_v28 }
  0x1a   :  { %626 = vmatprep.subr.mxu0 %v77_v13  ;;  %655 = vmatpush3.msra.mxu1 %v316_v28 }
  0x1b   :  { %627 = vmatpush3.msra.mxu0 %v77_v13  ;;  %656 = vmatprep.subr.mxu1 %v315_v29 }
  0x1c   :  { %628 = vmatprep.subr.mxu0 %v76_v14  ;;  %657 = vmatpush3.msra.mxu1 %v315_v29 }
  0x1d   :  { %629 = vmatpush3.msra.mxu0 %v76_v14  ;;  %658 = vmatprep.subr.mxu1 %v314_v30 }
  0x1e   :  { %630 = vmatprep.subr.mxu0 %v75_v15  ;;  %659 = vmatpush3.msra.mxu1 %v314_v30 }
  0x1f   :  { %631 = vmatpush3.msra.mxu0 %v75_v15  ;;  %660 = vmatprep.subr.mxu1 %v313_v31 }
  0x20   :  { %632 = vmatprep.subr.mxu0 %v74_v16  ;;  %661 = vmatpush3.msra.mxu1 %v313_v31 }
  0x21   :  { %633 = vmatpush3.msra.mxu0 %v74_v16  ;;  %662 = vmatprep.subr.mxu1 %v312_v32 }
  0x22   :  { %635 = vmatmul.mubr.f32.vlgmr.msra.gmra.mxu0 %v34_v17  ;;  %663 = vmatpush3.msra.mxu1 %v312_v32 }
  0x23   :  { %637 = vmatprep.mubr.f32.mxu0 %v35_v18  ;;  %664 = vmatprep.subr.mxu1 %v311_v33 }
  0x24   :  { %665 = vmatpush3.msra.mxu1 %v311_v33 }
  0x25   :  { %666 = vmatprep.subr.mxu1 %v310_v34 }
  0x26   :  { %638 = vmatmul.mubr.f32.gmra.mxu0 %v36_v19  ;;  %667 = vmatpush3.msra.mxu1 %v310_v34 }
  0x27   :  { %640 = vmatprep.mubr.f32.mxu0 %v37_v20  ;;  %668 = vmatprep.subr.mxu1 %v309_v35 }
  0x28   :  { %669 = vmatpush3.msra.mxu1 %v309_v35 }
  0x29   :  { %670 = vmatprep.subr.mxu1 %v308_v36 }
  0x2a   :  { %641 = vmatmul.mubr.f32.gmra.mxu0 %v38_v21  ;;  %671 = vmatpush3.msra.mxu1 %v308_v36 }
  0x2b   :  { %643 = vmatprep.mubr.f32.mxu0 %v39_v22  ;;  %672 = vmatprep.subr.mxu1 %v307_v37 }
  0x2c   :  { %673 = vmatpush3.msra.mxu1 %v307_v37 }
  0x2d   :  { %674 = vmatprep.subr.mxu1 %v306_v38 }
  0x2e   :  { %644 = vmatmul.mubr.f32.gmra.mxu0 %v40_v23  ;;  %675 = vmatpush3.msra.mxu1 %v306_v38  ;;  %v270_v38 = vlaneseq }
  0x2f   :  { %676 = vmatprep.subr.mxu1 %v305_v39 }
  0x30   :  { %677 = vmatpush3.msra.mxu1 %v305_v39  ;;  %v271_v39 = vshrl.u32 %v270_v38, 7 }
  0xe2   :  { %v636_v40 = vpop.f32.mrf.mxu0 }
  0xe3   :  { %v897_v45 = vadd.f32 %v636_v40, %v552_v41  ;;  %v91_v40 = vld [vmem:[%s992_s3] sm:$0x1] }
  0xe4   :  { %v165_v42 = vpop.f32.mrf.mxu0 }
  0xe5   :  { %v895_v43 = vadd.f32 %v552_v41, %v165_v42 }
  0xe6   :  { %v639_v44 = vpop.f32.mrf.mxu0 }
  0xe7   :  { %v212_v47 = vadd.f32 %v897_v45, %v895_v43  ;;  %v903_v50 = vadd.f32 %v639_v44, %v552_v41 }
  0xe8   :  { %v175_v46 = vpop.f32.mrf.mxu0 }
  0xe9   :  { %v901_v48 = vadd.f32 %v552_v41, %v175_v46  ;;  %v92_v46 = vld [vmem:[%s993_s4] sm:$0x1] }
  0xea   :  { %v642_v49 = vpop.f32.mrf.mxu0 }
  0xeb   :  { %v213_v51 = vadd.f32 %v212_v47, %v901_v48  ;;  %v909_v56 = vadd.f32 %v642_v49, %v552_v41 }
  0xec   :  { %v185_v52 = vpop.f32.mrf.mxu0 }
  0xed   :  { %v906_v53 = vadd.f32 %v552_v41, %v185_v52  ;;  %v214_v54 = vadd.f32 %v213_v51, %v903_v50 }
  0xee   :  { %v645_v55 = vpop.f32.mrf.mxu0 }
  0xef   :  { %v215_v57 = vadd.f32 %v214_v54, %v906_v53  ;;  %v915_v61 = vadd.f32 %v645_v55, %v552_v41 }
  0xf0   :  { %v195_v58 = vpop.f32.mrf.mxu0 }
  0xf1   :  { %v912_v59 = vadd.f32 %v552_v41, %v195_v58  ;;  %v216_v60 = vadd.f32 %v215_v57, %v909_v56  ;;  %v930_v41 = vsub.s32 0, %v271_v39 }
  0xf3   :  { %v217_v62 = vadd.f32 %v216_v60, %v912_v59 }
  0xf5   :  { %v218_v63 = vadd.f32 %v217_v62, %v915_v61 }
  0xf7   :  { %v219_v0 = vrot.slane %v218_v63, 4 }
  0xf9   :  { %v220_v1 = vadd.f32 %v219_v0, %v218_v63 }
  0xfb   :  { %v221_v2 = vrot.slane %v220_v1, 2 }
  0xfd   :  { %v222_v3 = vadd.f32 %v221_v2, %v220_v1 }
  0xff   :  { %v223_v4 = vrot.slane %v222_v3, 1 }
 0x101   :  { %v224_v5 = vadd.f32 %v223_v4, %v222_v3 }
 0x103   :  { %v225_v6 = vmul.f32 0.015625, %v224_v5 }
 0x105   :  { %v226_v7 = vsub.f32 %v895_v43, %v225_v6  ;;  %v227_v8 = vsub.f32 %v897_v45, %v225_v6  ;;  %v228_v9 = vsub.f32 %v901_v48, %v225_v6  ;;  %v229_v10 = vsub.f32 %v903_v50, %v225_v6 }
 0x106   :  { %v230_v13 = vsub.f32 %v906_v53, %v225_v6  ;;  %v231_v16 = vsub.f32 %v909_v56, %v225_v6  ;;  %v232_v19 = vsub.f32 %v912_v59, %v225_v6  ;;  %v233_v22 = vsub.f32 %v915_v61, %v225_v6 }
 0x107   :  { %v242_v11 = vmul.f32 %v226_v7, %v226_v7  ;;  %v243_v12 = vmul.f32 %v227_v8, %v227_v8  ;;  %v244_v14 = vmul.f32 %v228_v9, %v228_v9  ;;  %v245_v17 = vmul.f32 %v229_v10, %v229_v10 }
 0x108   :  { %v246_v20 = vmul.f32 %v230_v13, %v230_v13  ;;  %v247_v23 = vmul.f32 %v231_v16, %v231_v16  ;;  %v248_v25 = vmul.f32 %v232_v19, %v232_v19  ;;  %v249_v27 = vmul.f32 %v233_v22, %v233_v22 }
 0x109   :  { %v250_v15 = vadd.f32 %v243_v12, %v242_v11 }
 0x10b   :  { %v251_v18 = vadd.f32 %v250_v15, %v244_v14 }
 0x10d   :  { %v252_v21 = vadd.f32 %v251_v18, %v245_v17 }
 0x10f   :  { %v253_v24 = vadd.f32 %v252_v21, %v246_v20 }
 0x111   :  { %v254_v26 = vadd.f32 %v253_v24, %v247_v23 }
 0x113   :  { %v255_v28 = vadd.f32 %v254_v26, %v248_v25 }
 0x115   :  { %v256_v29 = vadd.f32 %v255_v28, %v249_v27 }
 0x117   :  { %v257_v30 = vrot.slane %v256_v29, 4 }
 0x119   :  { %v258_v31 = vadd.f32 %v257_v30, %v256_v29 }
 0x11b   :  { %v259_v32 = vrot.slane %v258_v31, 2 }
 0x11d   :  { %v260_v33 = vadd.f32 %v259_v32, %v258_v31 }
 0x11f   :  { %v261_v34 = vrot.slane %v260_v33, 1 }
 0x121   :  { %v262_v35 = vadd.f32 %v261_v34, %v260_v33 }
 0x123   :  { %v263_v36 = vmul.f32 0.015625, %v262_v35 }
 0x125   :  { %v264_v37 = vadd.f32 1e-05, %v263_v36 }
 0x127   :  { %693 = vrsqrt.f32 %v264_v37 }
 0x134   :  { %v694_v42 = vpop.eup %693 }
 0x135   :  { %v266_v44 = vmul.f32 %v694_v42, %v91_v40 }
 0x137   :  { %v267_v47 = vmul.f32 %v266_v44, %v225_v6  ;;  %v273_v49 = vrot.slane %v266_v44, %v930_v41 }
 0x139   :  { %v268_v51 = vsub.f32 %v92_v46, %v267_v47  ;;  %v275_v52 = vmul.f32 %v273_v49, %v895_v43  ;;  %v276_v55 = vmul.f32 %v273_v49, %v897_v45  ;;  %v277_v57 = vmul.f32 %v273_v49, %v901_v48 }
 0x13a   :  { %v278_v63 = vmul.f32 %v273_v49, %v903_v50  ;;  %v279_v2 = vmul.f32 %v273_v49, %v906_v53  ;;  %v280_v43 = vmul.f32 %v273_v49, %v909_v56  ;;  %v281_v45 = vmul.f32 %v273_v49, %v912_v59  ;;  %v553_v56 = vld [vmem:[%s995_s6] ss:$0 sm:$0xff] }
 0x13b   :  { %v287_v54 = vrot.slane %v268_v51, %v930_v41  ;;  %v282_v50 = vmul.f32 %v273_v49, %v915_v61 }
 0x13d   :  { %v289_v58 = vadd.f32 %v287_v54, %v275_v52  ;;  %v290_v60 = vadd.f32 %v287_v54, %v276_v55  ;;  %v291_v62 = vadd.f32 %v287_v54, %v277_v57  ;;  %v292_v3 = vadd.f32 %v287_v54, %v278_v63 }
 0x13e   :  { %v293_v5 = vadd.f32 %v287_v54, %v279_v2  ;;  %v294_v6 = vadd.f32 %v287_v54, %v280_v43  ;;  %v295_v8 = vadd.f32 %v287_v54, %v281_v45  ;;  %v296_v53 = vadd.f32 %v287_v54, %v282_v50 }
 0x13f   :  { %v297_v0 = vmax.f32 %v289_v58, 0.0  ;;  %v298_v1 = vmax.f32 %v290_v60, 0.0  ;;  %v299_v4 = vmax.f32 %v291_v62, 0.0  ;;  %v300_v48 = vmax.f32 %v292_v3, 0.0 }
 0x140   :  { %v301_v7 = vmax.f32 %v293_v5, 0.0  ;;  %v302_v9 = vmax.f32 %v294_v6, 0.0  ;;  %v303_v10 = vmax.f32 %v295_v8, 0.0  ;;  %v304_v11 = vmax.f32 %v296_v53, 0.0 }
 0x141   :  { %678 = vmatprep.mubr.f32.mxu1 %v297_v0 }
 0x142   :  { %679 = vmatmul.mubr.f32.vlgmr.msra.gmra.mxu1 %v298_v1 }
 0x143   :  { %681 = vmatprep.mubr.f32.mxu1 %v299_v4 }
 0x146   :  { %682 = vmatmul.mubr.f32.gmra.mxu1 %v300_v48 }
 0x147   :  { %684 = vmatprep.mubr.f32.mxu1 %v301_v7 }
 0x14a   :  { %685 = vmatmul.mubr.f32.gmra.mxu1 %v302_v9 }
 0x14b   :  { %687 = vmatprep.mubr.f32.mxu1 %v303_v10 }
 0x14e   :  { %688 = vmatmul.mubr.f32.gmra.mxu1 %v304_v11  ;;  %v322_v11 = vld [vmem:[%s996_s7] sm:$0x1]  ;;  %s719_s7 = smov [#allocation2]  }
 0x14f   :  { %s541_s1 = sshll.u32 %s719_s7, 4  ;;  %s542_s1 = int_to_ptr.vmem [resolvable:$true] %s541_s1 }
 0x150   :  { %p702_p1 = scmp.lt.s32.totalorder %s542_s1, %s542_s1 }
 0x202   :  { %v680_v12 = vpop.f32.mrf.mxu1 }
 0x203   :  { %v950_v15 = vadd.f32 %v680_v12, %v553_v56 }
 0x204   :  { %v396_v59 = vpop.f32.mrf.mxu1 }
 0x205   :  { %v948_v13 = vadd.f32 %v553_v56, %v396_v59  ;;  %v323_v59 = vld [vmem:[%s997_s8] sm:$0x1]  ;;  %s697_s8 = scalar_lea.vmem %s542_s1, 1024 }
 0x206   :  { %v683_v14 = vpop.f32.mrf.mxu1  ;;  %p698_p0 = scmp.ne.s32.totalorder %s542_s1, %s697_s8  ;;  %p703_p2 = scmp.lt.s32.totalorder %s697_s8, %s697_s8 }
 0x207   :  { %v443_v16 = vadd.f32 %v950_v15, %v948_v13  ;;  %v956_v19 = vadd.f32 %v683_v14, %v553_v56 }
 0x208   :  { %v406_v61 = vpop.f32.mrf.mxu1  ;;  %p704_p3 = por %p703_p2, %p702_p1 }
 0x209   :  { %v954_v17 = vadd.f32 %v553_v56, %v406_v61 }
 0x20a   :  { %v686_v18 = vpop.f32.mrf.mxu1  ;;  %p705_p4 = pnand %p704_p3, %p698_p0 }
 0x20b   :  { %v444_v20 = vadd.f32 %v443_v16, %v954_v17  ;;  %v962_v25 = vadd.f32 %v686_v18, %v553_v56 }
 0x20c   :  { %v416_v21 = vpop.f32.mrf.mxu1 }
 0x20d   :  { %v959_v22 = vadd.f32 %v553_v56, %v416_v21  ;;  %v445_v23 = vadd.f32 %v444_v20, %v956_v19 }
 0x20e   :  { %v689_v24 = vpop.f32.mrf.mxu1 }
 0x20f   :  { %v446_v26 = vadd.f32 %v445_v23, %v959_v22  ;;  %v432_v30 = vadd.f32 %v689_v24, %v553_v56 }
 0x210   :  { %v426_v27 = vpop.f32.mrf.mxu1 }
 0x211   :  { %v427_v28 = vadd.f32 %v553_v56, %v426_v27  ;;  %v447_v29 = vadd.f32 %v446_v26, %v962_v25 }
 0x213   :  { %v448_v31 = vadd.f32 %v447_v29, %v427_v28 }
 0x215   :  { %v449_v32 = vadd.f32 %v448_v31, %v432_v30 }
 0x217   :  { %v450_v33 = vrot.slane %v449_v32, 4 }
 0x219   :  { %v451_v34 = vadd.f32 %v450_v33, %v449_v32 }
 0x21b   :  { %v452_v35 = vrot.slane %v451_v34, 2 }
 0x21d   :  { %v453_v36 = vadd.f32 %v452_v35, %v451_v34 }
 0x21f   :  { %v454_v37 = vrot.slane %v453_v36, 1 }
 0x221   :  { %v455_v38 = vadd.f32 %v454_v37, %v453_v36 }
 0x223   :  { %v456_v39 = vmul.f32 0.015625, %v455_v38 }
 0x225   :  { %v457_v40 = vsub.f32 %v948_v13, %v456_v39  ;;  %v458_v42 = vsub.f32 %v950_v15, %v456_v39  ;;  %v459_v44 = vsub.f32 %v954_v17, %v456_v39  ;;  %v460_v46 = vsub.f32 %v956_v19, %v456_v39 }
 0x226   :  { %v461_v51 = vsub.f32 %v959_v22, %v456_v39  ;;  %v462_v55 = vsub.f32 %v962_v25, %v456_v39  ;;  %v463_v60 = vsub.f32 %v427_v28, %v456_v39  ;;  %v464_v0 = vsub.f32 %v432_v30, %v456_v39 }
 0x227   :  { %v473_v47 = vmul.f32 %v457_v40, %v457_v40  ;;  %v474_v49 = vmul.f32 %v458_v42, %v458_v42  ;;  %v475_v52 = vmul.f32 %v459_v44, %v459_v44  ;;  %v476_v57 = vmul.f32 %v460_v46, %v460_v46 }
 0x228   :  { %v477_v62 = vmul.f32 %v461_v51, %v461_v51  ;;  %v478_v1 = vmul.f32 %v462_v55, %v462_v55  ;;  %v479_v3 = vmul.f32 %v463_v60, %v463_v60  ;;  %v480_v5 = vmul.f32 %v464_v0, %v464_v0 }
 0x229   :  { %v481_v54 = vadd.f32 %v474_v49, %v473_v47 }
 0x22b   :  { %v482_v58 = vadd.f32 %v481_v54, %v475_v52 }
 0x22d   :  { %v483_v63 = vadd.f32 %v482_v58, %v476_v57 }
 0x22f   :  { %v484_v2 = vadd.f32 %v483_v63, %v477_v62 }
 0x231   :  { %v485_v4 = vadd.f32 %v484_v2, %v478_v1 }
 0x233   :  { %v486_v43 = vadd.f32 %v485_v4, %v479_v3 }
 0x235   :  { %v487_v45 = vadd.f32 %v486_v43, %v480_v5 }
 0x237   :  { %v488_v48 = vrot.slane %v487_v45, 4 }
 0x239   :  { %v489_v6 = vadd.f32 %v488_v48, %v487_v45 }
 0x23b   :  { %v490_v7 = vrot.slane %v489_v6, 2 }
 0x23d   :  { %v491_v8 = vadd.f32 %v490_v7, %v489_v6 }
 0x23f   :  { %v492_v50 = vrot.slane %v491_v8, 1 }
 0x241   :  { %v493_v9 = vadd.f32 %v492_v50, %v491_v8 }
 0x243   :  { %v494_v53 = vmul.f32 0.015625, %v493_v9 }
 0x245   :  { %v495_v10 = vadd.f32 1e-05, %v494_v53 }
 0x247   :  { %695 = vrsqrt.f32 %v495_v10 }
 0x254   :  { %v696_v12 = vpop.eup %695 }
 0x255   :  { %v497_v56 = vmul.f32 %v696_v12, %v322_v11 }
 0x257   :  { %v498_v14 = vmul.f32 %v497_v56, %v456_v39  ;;  %v504_v61 = vrot.slane %v497_v56, %v930_v41 }
 0x259   :  { %v499_v16 = vsub.f32 %v323_v59, %v498_v14  ;;  %v512_v18 = vmul.f32 %v504_v61, %v427_v28  ;;  %v506_v21 = vmul.f32 %v504_v61, %v948_v13  ;;  %v507_v23 = vmul.f32 %v504_v61, %v950_v15 }
 0x25a   :  { %v508_v24 = vmul.f32 %v504_v61, %v954_v17  ;;  %v509_v26 = vmul.f32 %v504_v61, %v956_v19  ;;  %v510_v27 = vmul.f32 %v504_v61, %v959_v22  ;;  %v511_v29 = vmul.f32 %v504_v61, %v962_v25 }
 0x25b   :  { %v518_v20 = vrot.slane %v499_v16, %v930_v41  ;;  %v513_v31 = vmul.f32 %v504_v61, %v432_v30 }
 0x25d   :  { %v526_v32 = vadd.f32 %v518_v20, %v512_v18  ;;  %v520_v33 = vadd.f32 %v518_v20, %v506_v21  ;;  %v521_v28 = vadd.f32 %v518_v20, %v507_v23  ;;  %v522_v34 = vadd.f32 %v518_v20, %v508_v24 }
 0x25e   :  { %v523_v41 = vadd.f32 %v518_v20, %v509_v26  ;;  %v524_v35 = vadd.f32 %v518_v20, %v510_v27  ;;  %v525_v13 = vadd.f32 %v518_v20, %v511_v29  ;;  %v527_v36 = vadd.f32 %v518_v20, %v513_v31 }
 0x25f   :  { %534 = vst [vmem:[#allocation2 + $0x30] sm:$0xff] %v526_v32  ;;  %528 = vst [vmem:[#allocation2] sm:$0xff] %v520_v33 }
 0x260   :  { %529 = vst [vmem:[#allocation2 + $0x8] sm:$0xff] %v521_v28  ;;  %530 = vst [vmem:[#allocation2 + $0x10] sm:$0xff] %v522_v34 }
 0x261   :  { %531 = vst [vmem:[#allocation2 + $0x18] sm:$0xff] %v523_v41  ;;  %532 = vst [vmem:[#allocation2 + $0x20] sm:$0xff] %v524_v35 }
 0x262   :  { %533 = vst [vmem:[#allocation2 + $0x28] sm:$0xff] %v525_v13  ;;  %535 = vst [vmem:[#allocation2 + $0x38] sm:$0xff] %v527_v36 }
 0x263   :  { %708 = shalt.err (!%p705_p4)
}
 0x264   :  { %s720_s29 = smov 128   ;;  %s721_s30 = smov 8  }
 0x265   :  { %547 = dma.vmem_to_hbm [thread:$0]  %s542_s1, 1024, %s998_s9, [#allocation3], %s720_s29, %s720_s29, %s721_s30  }
 0x266   :  { %717 = dma.done.wait [#allocation3], 1024  }
 0x267   :  { %718 = vsyncadd [#allocation3], 4294966272 }
 0x268   :  { %551 = vsyncpa [#allocation3], 1 }

</bundles_post_ra>
